<compile_context>
chip_gen: v7x
topology: tpu7x:2x2x1
jax: 0.10.0
libtpu: 0.0.40
codegen_flags: <defaults>
</compile_context>

<pallas_src>
import functools

import jax
import jax.numpy as jnp
from jax.experimental import pallas as pl
from jax.experimental.pallas import tpu as pltpu


def _sinc_kernel(x_ref, o_ref, *, omega):
    # normalized sinc: sin(pi*z)/(pi*z), z = omega * x
    x = x_ref[...].astype(jnp.float32)
    piz = (jnp.pi * omega) * x
    # Reciprocal issues on the EUP slot (off the VALU critical path); the
    # piz == 0 singularity (0 * inf -> NaN in the untaken branch) is masked
    # by the final select.
    y = jnp.sin(piz) * pl.reciprocal(piz, approx=False)
    y = jnp.where(piz == 0.0, 1.0, y)
    o_ref[...] = y.astype(o_ref.dtype)


def sinc_pallas(x, omega=30.0, *, target_block_bytes=1 << 20):
    """Elementwise sinc(omega * x) via a Pallas TPU kernel.

    Accepts any shape; internally flattens to a lane-dense 2-D slab.
    """
    orig_shape = x.shape
    orig_dtype = x.dtype
    n = x.size
    itemsize = jnp.dtype(orig_dtype).itemsize

    SUBLANE = 8
    # Widest lane (last) dim the input can reasonably fill -> unmasked vst,
    # fewer / larger DMA descriptors.
    LANES = 128
    for cand in (1024, 512, 256):
        if n >= cand * SUBLANE:
            LANES = cand
            break

    rows = pl.cdiv(n, LANES)
    rows_pad = pl.cdiv(rows, SUBLANE) * SUBLANE
    n_pad = rows_pad * LANES

    flat = jnp.ravel(x)
    if n_pad != n:
        # Only pad when the flat size does not already tile cleanly.
        flat = jnp.pad(flat, (0, n_pad - n))
    x2d = flat.reshape(rows_pad, LANES)

    # ~1 MiB blocks (HBM roofline flattens past this); in+out double-buffered
    # this is ~4 MiB of VMEM — comfortable on v5e/v6e (128 MiB) and v7x (64 MiB).
    block_rows = max(
        SUBLANE, (target_block_bytes // (LANES * itemsize)) // SUBLANE * SUBLANE
    )
    block_rows = min(block_rows, rows_pad)
    # Keep >= 2 grid steps where possible so v7x's two TensorCores both get work.
    if pl.cdiv(rows_pad, block_rows) < 2 and rows_pad >= 2 * SUBLANE:
        block_rows = pl.cdiv(pl.cdiv(rows_pad, 2), SUBLANE) * SUBLANE

    grid = (pl.cdiv(rows_pad, block_rows),)

    kernel = functools.partial(_sinc_kernel, omega=float(omega))

    cost = pl.CostEstimate(
        flops=6 * n_pad,
        transcendentals=2 * n_pad,          # sin + reciprocal per element
        bytes_accessed=2 * n_pad * itemsize,  # one read + one write
    )

    out2d = pl.pallas_call(
        kernel,
        out_shape=jax.ShapeDtypeStruct((rows_pad, LANES), orig_dtype),
        grid_spec=pltpu.PrefetchScalarGridSpec(
            num_scalar_prefetch=0,
            grid=grid,
            in_specs=[pl.BlockSpec((block_rows, LANES), lambda i: (i, 0))],
            out_specs=pl.BlockSpec((block_rows, LANES), lambda i: (i, 0)),
        ),
        compiler_params=pltpu.CompilerParams(
            dimension_semantics=("parallel",),
        ),
        cost_estimate=cost,
    )(x2d)

    if n_pad != n:
        out = out2d.reshape(-1)[:n].reshape(orig_shape)
    else:
        out = out2d.reshape(orig_shape)
    return out


def sinc_reference(x, omega=30.0):
    """Pure-JAX reference matching torch.sinc(omega * x)."""
    return jnp.sinc(omega * x)


if __name__ == "__main__":
    key = jax.random.PRNGKey(0)
    omega = 30.0

    # NCHW input, small shape; include an exact zero to exercise the singular point.
    x = jax.random.normal(key, (2, 4, 16, 16), dtype=jnp.float32)
    x = x.at[0, 0, 0, 0].set(0.0)

    y = jax.block_until_ready(sinc_pallas(x, omega))
    y_ref = sinc_reference(x, omega)
    assert y.shape == x.shape and y.dtype == x.dtype
    assert jnp.allclose(y, y_ref, atol=1e-5, rtol=1e-5), "mismatch vs reference"

    # Non-power-of-two shape: exercises the padding path and a multi-step grid
    # with a ragged last block.
    x2 = jax.random.normal(jax.random.PRNGKey(1), (3, 5, 17, 19), dtype=jnp.float32)
    x2 = x2.at[0, 0, 0, 0].set(0.0)
    y2 = jax.block_until_ready(sinc_pallas(x2, omega))
    y2_ref = sinc_reference(x2, omega)
    assert y2.shape == x2.shape and y2.dtype == x2.dtype
    assert jnp.allclose(y2, y2_ref, atol=1e-5, rtol=1e-5), "mismatch vs reference (ragged)"

    print("KERNEL_OK")
</pallas_src>

<mosaic_0001>
module attributes {stable_mosaic.version = 11 : i64} {
  func.func @_sinc_kernel(%arg0: i32, %arg1: memref<8x256xf32, #tpu.memory_space<vmem>>, %arg2: memref<8x256xf32, #tpu.memory_space<vmem>>) attributes {dimension_semantics = [#tpu.dimension_semantics<parallel>], iteration_bounds = array<i64: 1>, scalar_prefetch = 0 : i64, scratch_operands = 0 : i64, tpu.core_type = #tpu.core_type<tc>, window_params = [{transform_indices = @transform_0, window_bounds = array<i64: 8, 256>}, {transform_indices = @transform_1, window_bounds = array<i64: 8, 256>}]} {
    %c0 = arith.constant 0 : index
    %c0_0 = arith.constant 0 : index
    %0 = vector.load %arg1[%c0, %c0_0] : memref<8x256xf32, #tpu.memory_space<vmem>>, vector<8x256xf32>
    %cst = arith.constant 94.2477798 : f32
    %1 = vector.broadcast %cst : f32 to vector<8x256xf32>
    %2 = arith.mulf %1, %0 : vector<8x256xf32>
    %3 = math.sin %2 : vector<8x256xf32>
    %4 = tpu.reciprocal %2 : vector<8x256xf32> -> vector<8x256xf32>
    %5 = arith.mulf %3, %4 : vector<8x256xf32>
    %cst_1 = arith.constant 0.000000e+00 : f32
    %6 = vector.broadcast %cst_1 : f32 to vector<8x256xf32>
    %7 = arith.cmpf oeq, %2, %6 : vector<8x256xf32>
    %cst_2 = arith.constant 1.000000e+00 : f32
    %8 = vector.broadcast %cst_2 : f32 to vector<8x256xf32>
    %9 = arith.select %7, %8, %5 : vector<8x256xi1>, vector<8x256xf32>
    %c0_3 = arith.constant 0 : index
    %c0_4 = arith.constant 0 : index
    %10 = vector.load %arg2[%c0_3, %c0_4] : memref<8x256xf32, #tpu.memory_space<vmem>>, vector<8x256xf32>
    tpu.vector_store %arg2[%c0_3, %c0_4], %9 {strides = array<i32>} : memref<8x256xf32, #tpu.memory_space<vmem>>, vector<8x256xf32>,
    return
  }
  func.func @transform_0(%arg0: i32) -> (i32, i32) {
    %c0_i32 = arith.constant 0 : i32
    %c0_i32_0 = arith.constant 0 : i32
    return %arg0, %c0_i32 : i32, i32
  }
  func.func @transform_1(%arg0: i32) -> (i32, i32) {
    %c0_i32 = arith.constant 0 : i32
    %c0_i32_0 = arith.constant 0 : i32
    return %arg0, %c0_i32 : i32, i32
  }
}

</mosaic_0001>

<bundles_post_ra>
// kernel: tpu_custom_call.1
= control target key start
LH: loop header
LB: loop body
LE: loop exit
PB: predicated region body
PF: predicated region fallthrough
CT: control target
= control target key end

     0   :  { %6 = vsyncpa [#allocation3], 0  ;;  %s463_s0 = inlined_call_operand.hbm [shape: f32[8,256], index: 0, kind: input, shape index: {}]   ;;  %s464_s1 = inlined_call_operand.hbm [shape: f32[8,256], index: 1, kind: output, shape index: {}]  }
   0x1   :  { %7 = vsyncpa [#allocation4], 0  ;;  %s342_s6 = smov [#allocation2]   ;;  %s294_s10 = scalar_lea.hbm %s463_s0, 256 }
   0x2   :  { %s14_s7 = sshll.u32 %s342_s6, 4  ;;  %p295_p0 = scmp.ne.s32.totalorder %s463_s0, %s294_s10  ;;  %s15_s7 = int_to_ptr.vmem [resolvable:$true] %s14_s7 }
   0x3   :  { %p298_p1 = scmp.lt.u32.totalorder %s294_s10, %s463_s0 }
   0x5   :  { %p300_p2 = pnand %p298_p1, %p295_p0 }
   0x7   :  { %303 = shalt.err (!%p300_p2)
}
   0x8   :  { %s304_s15 = scalar_lea.vmem %s15_s7, 256  ;;  %p309_p4 = scmp.lt.s32.totalorder %s15_s7, %s15_s7 }
   0x9   :  { %p305_p3 = scmp.ne.s32.totalorder %s15_s7, %s304_s15  ;;  %p310_p5 = scmp.lt.s32.totalorder %s304_s15, %s304_s15 }
   0xb   :  { %p311_p6 = por %p310_p5, %p309_p4 }
   0xd   :  { %p312_p7 = pnand %p311_p6, %p305_p3 }
   0xf   :  { %315 = shalt.err (!%p312_p7)
}
  0x10   :  { %17 = dma.hbm_to_vmem [thread:$0]  %s463_s0, 256, %s15_s7, [#allocation3]  }
  0x11   :  { %338 = dma.done.wait [#allocation3], 256  }
  0x12   :  { %339 = vsyncadd [#allocation3], 4294967040  ;;  %v21_v0 = vld [vmem:[#allocation2] sm:$0xff]  ;;  %v22_v1 = vld [vmem:[#allocation2 + $0x8] sm:$0xff]  ;;  %v343_v23 = vmov 683565275  }
  0x13   :  { %v372_v2 = vmul.f32 94.24778, %v21_v0  ;;  %v374_v3 = vmul.f32 94.24778, %v22_v1  ;;  %v344_v25 = vmov 2475754826  }
  0x14   :  { %v345_v27 = vmov 2131351028   ;;  %v346_v29 = vmov 2102212464   ;;  %v347_v31 = vmov 920167782  }
  0x15   :  { %v25_v4 = vand.u32 2147483647, %v372_v2  ;;  %v28_v5 = vand.u32 2139095040, %v372_v2  ;;  %v132_v7 = vand.u32 2139095040, %v374_v3  ;;  %v129_v9 = vand.u32 2147483647, %v374_v3 }
  0x16   :  { %v348_v39 = vmov 1326507024   ;;  %vm27_vm14 = vcmp.lt.s32.totalorder %v372_v2, 0  ;;  %s349_s0 = smov [#allocation5]  }
  0x17   :  { %v29_v6 = vshrl.u32 %v28_v5, 23  ;;  %v32_v8 = vand.u32 8388607, %v25_v4  ;;  %v133_v11 = vshrl.u32 %v132_v7, 23  ;;  %v384_v15 = vand.u32 8388607, %v129_v9 }
  0x18   :  { %vm26_vm15 = vcmp.le.f32.partialorder %v25_v4, 0.7853982  ;;  %s249_s18 = sshll.u32 %s349_s0, 4  ;;  %s250_s18 = int_to_ptr.vmem [resolvable:$true] %s249_s18 }
  0x19   :  { %v258_v10 = vadd.s32 4294967169, %v29_v6  ;;  %v262_v13 = vadd.s32 4294967169, %v133_v11  ;;  %v33_v14 = vor.u32 8388608, %v32_v8  ;;  %v137_v21 = vor.u32 8388608, %v384_v15  ;;  %s316_s19 = scalar_lea.vmem %s250_s18, 256  ;;  %p321_p9 = scmp.lt.s32.totalorder %s250_s18, %s250_s18 }
  0x1a   :  { %p317_p8 = scmp.ne.s32.totalorder %s250_s18, %s316_s19  ;;  %p322_p10 = scmp.lt.s32.totalorder %s316_s19, %s316_s19 }
  0x1b   :  { %v35_v12 = vadd.s32 1, %v258_v10  ;;  %v139_v16 = vadd.s32 1, %v262_v13  ;;  %v386_v20 = vshll.u32 %v33_v14, 8 }
  0x1c   :  { %p323_p11 = por %p322_p10, %p321_p9 }
  0x1d   :  { %vm36_vm0 = vcmp.gt.s32.totalorder %v35_v12, 0  ;;  %vm140_vm1 = vcmp.gt.s32.totalorder %v139_v16, 0 }
  0x1e   :  { %v37_v17 = vsel %vm36_vm0, %v35_v12, 0  ;;  %v141_v33 = vsel %vm140_vm1, %v139_v16, 0  ;;  %vm131_vm0 = vcmp.lt.s32.totalorder %v374_v3, 0  ;;  %vm437_vm1 = vcmp.le.f32.partialorder %v129_v9, 0.7853982  ;;  %p324_p12 = pnand %p323_p11, %p317_p8 }
  0x1f   :  { %v38_v18 = vshrl.u32 %v37_v17, 5  ;;  %v39_v19 = vand.u32 31, %v37_v17  ;;  %v142_v46 = vshrl.u32 %v141_v33, 5  ;;  %v143_v47 = vand.u32 31, %v141_v33 }
  0x21   :  { %v40_v22 = vsub.s32 32, %v39_v19  ;;  %v42_v24 = vshll.u32 %v343_v23, %v39_v19  ;;  %v45_v26 = vshll.u32 %v344_v25, %v39_v19  ;;  %v48_v28 = vshll.u32 %v345_v27, %v39_v19 }
  0x22   :  { %v51_v30 = vshll.u32 %v346_v29, %v39_v19  ;;  %v54_v32 = vshll.u32 %v347_v31, %v39_v19  ;;  %vm57_vm2 = vcmp.lt.s32.totalorder %v38_v18, 1  ;;  %vm58_vm3 = vcmp.lt.s32.totalorder %v38_v18, 2 }
  0x23   :  { %v41_v34 = vshrl.u32 %v343_v23, %v40_v22  ;;  %v43_v35 = vshrl.u32 %v344_v25, %v40_v22  ;;  %v46_v36 = vshrl.u32 %v345_v27, %v40_v22  ;;  %v49_v37 = vshrl.u32 %v346_v29, %v40_v22 }
  0x24   :  { %v52_v38 = vshrl.u32 %v347_v31, %v40_v22  ;;  %v55_v40 = vshrl.u32 %v348_v39, %v40_v22  ;;  %vm59_vm4 = vcmp.lt.s32.totalorder %v38_v18, 3  ;;  %vm60_vm5 = vcmp.lt.s32.totalorder %v38_v18, 4 }
  0x25   :  { %v44_v41 = vor.u32 %v43_v35, %v42_v24  ;;  %v47_v42 = vor.u32 %v46_v36, %v45_v26  ;;  %v50_v43 = vor.u32 %v49_v37, %v48_v28  ;;  %v144_v55 = vsub.s32 32, %v143_v47 }
  0x26   :  { %v53_v44 = vor.u32 %v52_v38, %v51_v30  ;;  %v56_v45 = vor.u32 %v55_v40, %v54_v32  ;;  %v146_v59 = vshll.u32 %v343_v23, %v143_v47  ;;  %v149_v8 = vshll.u32 %v344_v25, %v143_v47 }
  0x27   :  { %v61_v48 = vsel %vm57_vm2, %v41_v34, %v44_v41  ;;  %v62_v49 = vsel %vm60_vm5, %v50_v43, 2102212464  ;;  %v65_v50 = vsel %vm57_vm2, %v44_v41, %v47_v42  ;;  %v69_v51 = vsel %vm57_vm2, %v47_v42, %v50_v43 }
  0x28   :  { %v63_v52 = vsel %vm59_vm4, %v47_v42, %v62_v49  ;;  %v66_v53 = vsel %vm60_vm5, %v53_v44, 920167782  ;;  %v70_v54 = vsel %vm60_vm5, %v56_v45, 1326507024  ;;  %v145_v63 = vshrl.u32 %v343_v23, %v144_v55 }
  0x29   :  { %v64_v56 = vsel %vm58_vm3, %v61_v48, %v63_v52  ;;  %v67_v57 = vsel %vm59_vm4, %v50_v43, %v66_v53  ;;  %v71_v58 = vsel %vm59_vm4, %v53_v44, %v70_v54  ;;  %v147_v7 = vshrl.u32 %v344_v25, %v144_v55 }
  0x2a   :  { %v68_v60 = vsel %vm58_vm3, %v65_v50, %v67_v57  ;;  %v72_v61 = vsel %vm58_vm3, %v69_v51, %v71_v58  ;;  %v80_v62 = vmul.u32 %v386_v20, %v64_v56  ;;  %v150_v10 = vshrl.u32 %v345_v27, %v144_v55 }
  0x2b   :  { %v400_v0 = vmul.u32.u64.low %v386_v20, %v72_v61  ;;  %v401_v1 = vmul.u32.u64.high %v386_v20, %v72_v61, %v400_v0  ;;  %v404_v5 = vmul.u32.u64.low %v386_v20, %v68_v60  ;;  %v405_v6 = vmul.u32.u64.high %v386_v20, %v68_v60, %v404_v5 }
  0x2c   :  { %v152_v11 = vshll.u32 %v345_v27, %v143_v47  ;;  %v153_v12 = vshrl.u32 %v346_v29, %v144_v55  ;;  %v155_v13 = vshll.u32 %v346_v29, %v143_v47  ;;  %v156_v14 = vshrl.u32 %v347_v31, %v144_v55 }
  0x2d   :  { %v158_v16 = vshll.u32 %v347_v31, %v143_v47  ;;  %v148_v17 = vor.u32 %v147_v7, %v146_v59  ;;  %v151_v18 = vor.u32 %v150_v10, %v149_v8  ;;  %v159_v19 = vshrl.u32 %v348_v39, %v144_v55 }
  0x2e   :  { %vm161_vm6 = vcmp.lt.s32.totalorder %v142_v46, 1  ;;  %vm82_vm7 = vc.u32 %v401_v1, %v404_v5  ;;  %v83_v22 = vadd.s32 1, %v405_v6  ;;  %v154_v23 = vor.u32 %v153_v12, %v152_v11 }
  0x2f   :  { %v177_v20 = vshll.u32 %v137_v21, 8  ;;  %v157_v24 = vor.u32 %v156_v14, %v155_v13  ;;  %v160_v25 = vor.u32 %v159_v19, %v158_v16  ;;  %vm162_vm8 = vcmp.lt.s32.totalorder %v142_v46, 2 }
  0x30   :  { %vm163_vm9 = vcmp.lt.s32.totalorder %v142_v46, 3  ;;  %v84_v26 = vsel %vm82_vm7, %v83_v22, %v405_v6  ;;  %vm164_vm10 = vcmp.lt.s32.totalorder %v142_v46, 4  ;;  %v165_v27 = vsel %vm161_vm6, %v145_v63, %v148_v17 }
  0x31   :  { %v169_v28 = vsel %vm161_vm6, %v148_v17, %v151_v18  ;;  %v85_v29 = vadd.s32 %v84_v26, %v80_v62  ;;  %v166_v30 = vsel %vm164_vm10, %v154_v23, 2102212464  ;;  %v170_v31 = vsel %vm164_vm10, %v157_v24, 920167782 }
  0x32   :  { %v173_v32 = vsel %vm161_vm6, %v151_v18, %v154_v23  ;;  %v167_v33 = vsel %vm163_vm9, %v151_v18, %v166_v30  ;;  %v171_v34 = vsel %vm163_vm9, %v154_v23, %v170_v31  ;;  %v174_v15 = vsel %vm164_vm10, %v160_v25, 1326507024 }
  0x33   :  { %v86_v21 = vadd.s32 536870912, %v85_v29  ;;  %v172_v35 = vsel %vm162_vm8, %v169_v28, %v171_v34  ;;  %v175_v36 = vsel %vm163_vm9, %v157_v24, %v174_v15  ;;  %v168_v37 = vsel %vm162_vm8, %v165_v27, %v167_v33 }
  0x34   :  { %v176_v38 = vsel %vm162_vm8, %v173_v32, %v175_v36  ;;  %v418_v39 = vmul.u32.u64.low %v177_v20, %v172_v35  ;;  %v419_v40 = vmul.u32.u64.high %v177_v20, %v172_v35, %v418_v39  ;;  %v184_v45 = vmul.u32 %v177_v20, %v168_v37 }
  0x35   :  { %v87_v41 = vshrl.u32 %v86_v21, 30  ;;  %v421_v42 = vmul.u32.u64.low %v177_v20, %v176_v38  ;;  %v422_v43 = vmul.u32.u64.high %v177_v20, %v176_v38, %v421_v42  ;;  %v81_v57 = vadd.s32 %v404_v5, %v401_v1 }
  0x36   :  { %v187_v47 = vadd.s32 1, %v419_v40  ;;  %vm117_vm5 = vweird.f32 %v372_v2  ;;  %vm237_vm6 = vcmp.eq.f32.partialorder %v372_v2, 0.0  ;;  %vm221_vm10 = vweird.f32 %v374_v3 }
  0x37   :  { %v88_v44 = vshll.u32 %v87_v41, 30  ;;  %vm186_vm11 = vc.u32 %v422_v43, %v418_v39  ;;  %v111_v17 = vsub.s32 4, %v87_v41  ;;  %v185_v1 = vadd.s32 %v418_v39, %v422_v43 }
  0x38   :  { %v188_v49 = vsel %vm186_vm11, %v187_v47, %v419_v40  ;;  %vm238_vm11 = vcmp.eq.f32.partialorder %v374_v3, 0.0 }
  0x39   :  { %v89_v48 = vsub.s32 %v85_v29, %v88_v44  ;;  %v189_v51 = vadd.s32 %v188_v49, %v184_v45  ;;  %v112_v24 = vsel %vm27_vm14, %v111_v17, %v87_v41 }
  0x3a   :  { %v114_v29 = vsel %vm26_vm15, 0, %v112_v24 }
  0x3b   :  { %v91_v50 = vsub.s32 0, %v89_v48  ;;  %v190_v52 = vadd.s32 536870912, %v189_v51  ;;  %v118_v34 = vadd.s32 3, %v114_v29 }
  0x3d   :  { %v259_v46 = vmin.u32 %v91_v50, %v89_v48  ;;  %v191_v54 = vshrl.u32 %v190_v52, 30  ;;  %v119_v35 = vand.u32 3, %v118_v34 }
  0x3f   :  { %v93_v53 = vclz %v259_v46  ;;  %v192_v56 = vshll.u32 %v191_v54, 30  ;;  %v215_v21 = vsub.s32 4, %v191_v54  ;;  %vm124_vm2 = vcmp.eq.s32.totalorder %v119_v35, 2 }
  0x40   :  { %vm121_vm3 = vcmp.eq.s32.totalorder %v119_v35, 0  ;;  %vm120_vm4 = vcmp.lt.s32.totalorder %v119_v35, 2 }
  0x41   :  { %v260_v55 = vadd.s32 4294967294, %v93_v53  ;;  %v193_v59 = vsub.s32 %v189_v51, %v192_v56  ;;  %v216_v38 = vsel %vm131_vm0, %v215_v21, %v191_v54 }
  0x42   :  { %v218_v42 = vsel %vm437_vm1, 0, %v216_v38 }
  0x43   :  { %vm261_vm12 = vcmp.lt.s32.totalorder %v260_v55, 0  ;;  %v195_v63 = vsub.s32 0, %v193_v59  ;;  %v222_v47 = vadd.s32 3, %v218_v42 }
  0x44   :  { %v96_v58 = vsel %vm261_vm12, 0, %v260_v55 }
  0x45   :  { %v97_v60 = vsub.s32 32, %v96_v58  ;;  %v98_v61 = vshll.u32 %v89_v48, %v96_v58  ;;  %v101_v62 = vsub.s32 4294967266, %v96_v58  ;;  %v263_v7 = vmin.u32 %v195_v63, %v193_v59 }
  0x46   :  { %v223_v52 = vand.u32 3, %v222_v47 }
  0x47   :  { %v99_v0 = vshrl.u32 %v81_v57, %v97_v60  ;;  %v102_v6 = vadd.s32 127, %v101_v62  ;;  %v197_v11 = vclz %v263_v7 }
  0x48   :  { %vm228_vm7 = vcmp.eq.s32.totalorder %v223_v52, 2  ;;  %vm225_vm8 = vcmp.eq.s32.totalorder %v223_v52, 0  ;;  %vm224_vm9 = vcmp.lt.s32.totalorder %v223_v52, 2 }
  0x49   :  { %v100_v8 = vor.u32 %v99_v0, %v98_v61  ;;  %v103_v10 = vshll.u32 %v102_v6, 23  ;;  %v264_v14 = vadd.s32 4294967294, %v197_v11 }
  0x4b   :  { %v104_v12 = vor.u32 4788187, %v103_v10  ;;  %v107_v13 = vcvt.s32.f32 %v100_v8  ;;  %vm265_vm13 = vcmp.lt.s32.totalorder %v264_v14, 0 }
  0x4c   :  { %v200_v18 = vsel %vm265_vm13, 0, %v264_v14 }
  0x4d   :  { %v105_v16 = vand.u32 2147483647, %v104_v12  ;;  %v201_v19 = vsub.s32 32, %v200_v18  ;;  %v202_v22 = vshll.u32 %v193_v59, %v200_v18  ;;  %v205_v23 = vsub.s32 4294967266, %v200_v18 }
  0x4f   :  { %v108_v5 = vmul.f32 %v107_v13, %v105_v16  ;;  %v203_v25 = vshrl.u32 %v185_v1, %v201_v19  ;;  %v206_v26 = vadd.s32 127, %v205_v23 }
  0x51   :  { %v109_v20 = vxor.u32 2147483648, %v108_v5  ;;  %v204_v30 = vor.u32 %v203_v25, %v202_v22  ;;  %v207_v31 = vshll.u32 %v206_v26, 23 }
  0x53   :  { %v110_v27 = vsel %vm27_vm14, %v109_v20, %v108_v5  ;;  %v208_v32 = vor.u32 4788187, %v207_v31  ;;  %v211_v33 = vcvt.s32.f32 %v204_v30 }
  0x54   :  { %v113_v28 = vsel %vm26_vm15, %v372_v2, %v110_v27 }
  0x55   :  { %282 = vcosq.f32 %v113_v28  ;;  %v209_v15 = vand.u32 2147483647, %v208_v32 }
  0x56   :  { %284 = vsinq.f32 %v113_v28 }
  0x57   :  { %286 = vrcp.f32 %v372_v2  ;;  %v212_v4 = vmul.f32 %v211_v33, %v209_v15 }
  0x59   :  { %v213_v37 = vxor.u32 2147483648, %v212_v4 }
  0x5b   :  { %v214_v39 = vsel %vm131_vm0, %v213_v37, %v212_v4 }
  0x5c   :  { %v217_v41 = vsel %vm437_vm1, %v374_v3, %v214_v39 }
  0x5d   :  { %288 = vcosq.f32 %v217_v41 }
  0x5e   :  { %290 = vsinq.f32 %v217_v41 }
  0x5f   :  { %v283_v40 = vpop.eup %282  ;;  %292 = vrcp.f32 %v374_v3 }
  0x60   :  { %v285_v43 = vpop.eup %284  ;;  %v125_v44 = vxor.u32 2147483648, %v283_v40 }
  0x61   :  { %v122_v9 = vxor.u32 2147483648, %v285_v43  ;;  %v287_v48 = vpop.eup %286 }
  0x62   :  { %v126_v45 = vsel %vm124_vm2, %v125_v44, %v285_v43 }
  0x63   :  { %v123_v49 = vsel %vm121_vm3, %v283_v40, %v122_v9 }
  0x64   :  { %v127_v50 = vsel %vm120_vm4, %v123_v49, %v126_v45 }
  0x65   :  { %v128_v51 = vsel %vm117_vm5, nan, %v127_v50 }
  0x66   :  { %v235_v46 = vmul.f32 %v287_v48, %v128_v51 }
  0x67   :  { %v289_v54 = vpop.eup %288 }
  0x68   :  { %v239_v53 = vsel %vm237_vm6, 1.0, %v235_v46  ;;  %v291_v55 = vpop.eup %290  ;;  %v229_v56 = vxor.u32 2147483648, %v289_v54 }
  0x69   :  { %241 = vst [vmem:[#allocation5] sm:$0xff] %v239_v53  ;;  %v226_v57 = vxor.u32 2147483648, %v291_v55  ;;  %v293_v59 = vpop.eup %292 }
  0x6a   :  { %v230_v58 = vsel %vm228_vm7, %v229_v56, %v291_v55 }
  0x6b   :  { %v227_v60 = vsel %vm225_vm8, %v289_v54, %v226_v57 }
  0x6c   :  { %v231_v61 = vsel %vm224_vm9, %v227_v60, %v230_v58 }
  0x6d   :  { %v232_v2 = vsel %vm221_vm10, nan, %v231_v61 }
  0x6e   :  { %v236_v62 = vmul.f32 %v293_v59, %v232_v2 }
  0x70   :  { %v240_v63 = vsel %vm238_vm11, 1.0, %v236_v62 }
  0x71   :  { %242 = vst [vmem:[#allocation5 + $0x8] sm:$0xff] %v240_v63 }
  0x72   :  { %327 = shalt.err (!%p324_p12)
}
  0x73   :  { %s328_s22 = scalar_lea.hbm %s464_s1, 256 }
  0x74   :  { %p329_p13 = scmp.ne.s32.totalorder %s464_s1, %s328_s22  ;;  %p332_p0 = scmp.lt.u32.totalorder %s328_s22, %s464_s1 }
  0x76   :  { %p334_p1 = pnand %p332_p0, %p329_p13 }
  0x78   :  { %337 = shalt.err (!%p334_p1)
}
  0x79   :  { %252 = dma.vmem_to_hbm [thread:$0]  %s250_s18, 256, %s464_s1, [#allocation4]  }
  0x7a   :  { %340 = dma.done.wait [#allocation4], 256  }
  0x7b   :  { %341 = vsyncadd [#allocation4], 4294967040 }
  0x7c   :  { %256 = vsyncpa [#allocation3], 1 }
  0x7d   :  { %257 = vsyncpa [#allocation4], 1 }

</bundles_post_ra>
